<compile_context>
chip_gen: v7x
topology: tpu7x:2x2x1
jax: 0.10.0
libtpu: 0.0.40
codegen_flags: <defaults>
</compile_context>

<pallas_src>
import jax
import jax.numpy as jnp
from jax.experimental import pallas as pl
from jax.experimental.pallas import tpu as pltpu

# ---------------- model dims (QRDQN(64, 64) defaults) ----------------
OBS = 64
ENC_HIDDEN = [128, 128, 64]
HEAD_HIDDEN = ENC_HIDDEN[-1]            # 64
ACTION = 64
NUM_QUANTILES = 32
QF = ACTION * NUM_QUANTILES             # 2048
BATCH = 4

LANE = 128                              # padded lane width for the small layers
SUBLANE = 8                             # f32 sublane tile

# Small-weight pack layout: rows of a (576, 128) f32 buffer (all 8-aligned).
W0_R0, W0_R1 = 0, 64          # W0       (64, 128)
W1_R0, W1_R1 = 64, 192        # W1       (128, 128)
W2_R0, W2_R1 = 192, 320       # W2       (128, 128)  cols 64:128 are zero
W3_R0, W3_R1 = 320, 448       # W3       (128, 128)  rows/cols 64:128 are zero
W4M_R0, W4M_R1 = 448, 576     # W4_mean  (128, 128)  rows/cols 64:128 are zero
WPACK_ROWS = 576

# Bias pack layout: lanes of a (1, 2688) f32 buffer (all starts 128-aligned).
B0_L, B1_L, B2_L, B3_L, B4M_L, B4_L = 0, 128, 256, 384, 512, 640
BPACK_LANES = B4_L + QF       # 2688


def _qrdqn_kernel(x_ref, wp_ref, bp_ref, w4_ref, q_ref, logit_ref):
    """Whole QRDQN forward for one (padded) batch block, fully VMEM-resident."""
    x = x_ref[...]                                              # (Bp, 64) f32

    def dense_relu(h, w, b):
        y = jnp.dot(h, w, preferred_element_type=jnp.float32) + b
        return jnp.maximum(y, 0.0)

    # FCEncoder: Linear+ReLU x3 (widths padded to 128 lanes; pad lanes stay 0).
    h = dense_relu(x, wp_ref[W0_R0:W0_R1, :], bp_ref[:, B0_L:B0_L + LANE])
    h = dense_relu(h, wp_ref[W1_R0:W1_R1, :], bp_ref[:, B1_L:B1_L + LANE])
    h = dense_relu(h, wp_ref[W2_R0:W2_R1, :], bp_ref[:, B2_L:B2_L + LANE])
    # QRDQNHead MLP (layer_num=1): Linear+ReLU
    h = dense_relu(h, wp_ref[W3_R0:W3_R1, :], bp_ref[:, B3_L:B3_L + LANE])
    # h is (Bp, 128) f32; lanes 64:128 are exactly zero.

    # logit = mean over quantiles of q, folded into an affine map.
    # W4_mean is zero-padded to 128 rows so the full-lane f32 h feeds the MXU
    # directly (no cast round-trip, no lane compaction on the critical chain).
    logit_ref[...] = (
        jnp.dot(h, wp_ref[W4M_R0:W4M_R1, :], preferred_element_type=jnp.float32)
        + bp_ref[:, B4M_L:B4M_L + LANE])                        # (Bp, 128), lanes 64: == 0

    # Head final Linear (no activation): hidden -> action * num_quantiles.
    # Single bf16 cast of h, sliced to the real 64 features only for this matmul.
    hb = h.astype(jnp.bfloat16)[:, :HEAD_HIDDEN]                # (Bp, 64) bf16
    q_ref[...] = (
        jnp.dot(hb, w4_ref[...], preferred_element_type=jnp.float32)
        + bp_ref[:, B4_L:B4_L + QF])                            # (Bp, 2048) f32


def pack_params(params):
    """One-time host-side packing of the 5 Linear layers into 3 buffers."""
    (w0, b0), (w1, b1), (w2, b2), (w3, b3), (w4, b4) = params

    def pad2(a, rows, cols):
        out = jnp.zeros((rows, cols), jnp.float32)
        return out.at[:a.shape[0], :a.shape[1]].set(a.astype(jnp.float32))

    w4_bf16 = w4.astype(jnp.bfloat16)                           # (64, 2048)
    # Mean over quantiles of the (bf16-rounded) final weight/bias: the exact
    # affine map whose output equals q.mean(-1) (up to f32 accumulation order
    # and the one bf16 rounding of h used on the q path).
    w4_mean = (w4_bf16.astype(jnp.float32)
               .reshape(HEAD_HIDDEN, ACTION, NUM_QUANTILES).mean(-1))     # (64, 64)
    b4_mean = b4.reshape(1, ACTION, NUM_QUANTILES).mean(-1)               # (1, 64)

    w_pack = jnp.concatenate([
        pad2(w0, 64, LANE),
        pad2(w1, 128, LANE),
        pad2(w2, 128, LANE),
        pad2(w3, 128, LANE),
        pad2(w4_mean, 128, LANE),          # padded to 128 rows (rows 64: zero)
    ], axis=0)                                                  # (576, 128) f32
    assert w_pack.shape == (WPACK_ROWS, LANE)

    b_pack = jnp.concatenate([
        pad2(b0, 1, LANE), pad2(b1, 1, LANE), pad2(b2, 1, LANE),
        pad2(b3, 1, LANE), pad2(b4_mean, 1, LANE),
        b4.astype(jnp.float32),
    ], axis=1)                                                  # (1, 2688) f32
    assert b_pack.shape == (1, BPACK_LANES)

    return w_pack, b_pack, w4_bf16


def qrdqn_forward(x, packed):
    """x: (B, OBS) float32. packed = pack_params(params). Returns dict like PyTorch."""
    B = x.shape[0]
    w_pack, b_pack, w4_bf16 = packed

    # Pad batch to a sublane multiple so every load/store is an unmasked
    # (8,128) tile; padded rows are zeros and are sliced away below.
    B_pad = max(SUBLANE, ((B + SUBLANE - 1) // SUBLANE) * SUBLANE)
    x_in = x.astype(jnp.float32)
    if B_pad != B:
        x_in = jnp.zeros((B_pad, OBS), jnp.float32).at[:B].set(x_in)

    vmem = pl.BlockSpec(memory_space=pltpu.MemorySpace.VMEM)

    # TODO(synk): if the RL loop vectorizes environments to B >= a few hundred,
    # add a batch grid axis (tile ~256 rows) with
    # dimension_semantics=("parallel",) and constant index_maps for the three
    # weight buffers so they stay VMEM-resident across batch steps.
    q_flat, logit_pad = pl.pallas_call(
        _qrdqn_kernel,
        out_shape=(
            jax.ShapeDtypeStruct((B_pad, QF), jnp.float32),
            jax.ShapeDtypeStruct((B_pad, LANE), jnp.float32),
        ),
        in_specs=[vmem, vmem, vmem, vmem],
        out_specs=(vmem, vmem),
    )(x_in, w_pack, b_pack, w4_bf16)

    q = q_flat[:B].reshape(B, ACTION, NUM_QUANTILES)
    logit = logit_pad[:B, :ACTION]

    # tau: quantile-bin midpoints, a pure constant (same as the PyTorch module).
    tau_edges = jnp.linspace(0.0, 1.0, NUM_QUANTILES + 1, dtype=jnp.float32)
    tau = ((tau_edges[:-1] + tau_edges[1:]) * 0.5).reshape(1, NUM_QUANTILES, 1)
    tau = jnp.broadcast_to(tau, (B, NUM_QUANTILES, 1))

    return {"logit": logit, "q": q, "tau": tau}


def init_params(key):
    """Deterministic synthetic parameters (Linear layers: W (in,out), b (1,out))."""
    dims = [
        (OBS, ENC_HIDDEN[0]),                     # encoder.init
        (ENC_HIDDEN[0], ENC_HIDDEN[1]),           # encoder.main[0]
        (ENC_HIDDEN[1], ENC_HIDDEN[2]),           # encoder.main[1]
        (HEAD_HIDDEN, HEAD_HIDDEN),               # head MLP (layer_num=1)
        (HEAD_HIDDEN, ACTION * NUM_QUANTILES),    # head final Linear
    ]
    params = []
    for i, (din, dout) in enumerate(dims):
        kw, kb = jax.random.split(jax.random.fold_in(key, i))
        scale = 1.0 / jnp.sqrt(jnp.float32(din))
        w = jax.random.uniform(kw, (din, dout), jnp.float32, -scale, scale)
        b = jax.random.uniform(kb, (1, dout), jnp.float32, -scale, scale)
        params.append((w, b))
    return params


def _reference_forward(x, params, *, matched):
    """Pure-JAX reference. matched=True mirrors the kernel's bf16 final layer
    and its folded-mean logit; matched=False is the full-f32 PyTorch module."""
    h = x
    for w, b in params[:4]:
        h = jnp.maximum(
            jnp.dot(h, w, precision=jax.lax.Precision.HIGHEST) + b, 0.0)
    w4, b4 = params[4]
    if matched:
        w4b = w4.astype(jnp.bfloat16)
        qf = jnp.dot(h.astype(jnp.bfloat16), w4b,
                     preferred_element_type=jnp.float32) + b4
        w4_mean = (w4b.astype(jnp.float32)
                   .reshape(HEAD_HIDDEN, ACTION, NUM_QUANTILES).mean(-1))
        b4_mean = b4.reshape(1, ACTION, NUM_QUANTILES).mean(-1)
        logit = jnp.dot(h, w4_mean, precision=jax.lax.Precision.HIGHEST) + b4_mean
        q = qf.reshape(x.shape[0], ACTION, NUM_QUANTILES)
    else:
        qf = jnp.dot(h, w4, precision=jax.lax.Precision.HIGHEST) + b4
        q = qf.reshape(x.shape[0], ACTION, NUM_QUANTILES)
        logit = q.mean(-1)
    return q, logit


if __name__ == "__main__":
    key = jax.random.PRNGKey(0)
    kx, kp = jax.random.split(key)
    x = jax.random.normal(kx, (BATCH, OBS), jnp.float32)
    params = init_params(kp)
    packed = pack_params(params)

    out = qrdqn_forward(x, packed)
    jax.block_until_ready(out)

    assert out["logit"].shape == (BATCH, ACTION)
    assert out["q"].shape == (BATCH, ACTION, NUM_QUANTILES)
    assert out["tau"].shape == (BATCH, NUM_QUANTILES, 1)

    # Internal consistency: logit is q.mean(-1) up to (a) f32 accumulation
    # reordering and (b) the single bf16 rounding of h used only on the q
    # path; the fold of the mean into a matmul is exact mathematically.
    # Documented: downstream users must not assume bit-exact equality.
    assert jnp.allclose(out["logit"], out["q"].mean(-1), atol=3e-3, rtol=3e-3)

    # Matched reference (same bf16 final layer / folded-mean logit as kernel).
    q_m, logit_m = _reference_forward(x, params, matched=True)
    assert jnp.allclose(out["q"], q_m, atol=1e-2, rtol=1e-2)
    assert jnp.allclose(out["logit"], logit_m, atol=1e-2, rtol=1e-2)

    # Full-f32 PyTorch-equivalent reference (loose tol: final layer is bf16).
    q_f, logit_f = _reference_forward(x, params, matched=False)
    assert jnp.allclose(out["q"], q_f, atol=5e-2, rtol=5e-2)
    assert jnp.allclose(out["logit"], logit_f, atol=5e-2, rtol=5e-2)

    print("KERNEL_OK")
</pallas_src>

<mosaic_0001>
module attributes {stable_mosaic.version = 11 : i64} {
  func.func @_qrdqn_kernel(%arg0: memref<8x64xf32, #tpu.memory_space<vmem>>, %arg1: memref<576x128xf32, #tpu.memory_space<vmem>>, %arg2: memref<1x2688xf32, #tpu.memory_space<vmem>>, %arg3: memref<64x2048xbf16, #tpu.memory_space<vmem>>, %arg4: memref<8x2048xf32, #tpu.memory_space<vmem>>, %arg5: memref<8x128xf32, #tpu.memory_space<vmem>>) attributes {dimension_semantics = [], scalar_prefetch = 0 : i64, scratch_operands = 0 : i64, tpu.core_type = #tpu.core_type<tc>} {
    %c0 = arith.constant 0 : index
    %c0_0 = arith.constant 0 : index
    %0 = vector.load %arg0[%c0, %c0_0] : memref<8x64xf32, #tpu.memory_space<vmem>>, vector<8x64xf32>
    %c0_1 = arith.constant 0 : index
    %c0_2 = arith.constant 0 : index
    %1 = vector.load %arg1[%c0_1, %c0_2] : memref<576x128xf32, #tpu.memory_space<vmem>>, vector<64x128xf32>
    %c0_3 = arith.constant 0 : index
    %c0_4 = arith.constant 0 : index
    %2 = vector.load %arg2[%c0_3, %c0_4] : memref<1x2688xf32, #tpu.memory_space<vmem>>, vector<1x128xf32>
    %cst = arith.constant dense<0.000000e+00> : vector<8x128xf32>
    %3 = tpu.matmul %0, %1, %cst {dimension_numbers = #tpu.dot_dimension_numbers<[1], [0], [0], [1], [0, 0, 1, 1], [], []>} : vector<8x64xf32>, vector<64x128xf32>, vector<8x128xf32> -> vector<8x128xf32>
    %4 = vector.broadcast %2 : vector<1x128xf32> to vector<8x128xf32>
    %5 = arith.addf %3, %4 : vector<8x128xf32>
    %cst_5 = arith.constant 0.000000e+00 : f32
    %6 = vector.broadcast %cst_5 : f32 to vector<8x128xf32>
    %7 = arith.maximumf %5, %6 : vector<8x128xf32>
    %c64 = arith.constant 64 : index
    %c0_6 = arith.constant 0 : index
    %8 = vector.load %arg1[%c64, %c0_6] : memref<576x128xf32, #tpu.memory_space<vmem>>, vector<128x128xf32>
    %c0_7 = arith.constant 0 : index
    %c128 = arith.constant 128 : index
    %9 = vector.load %arg2[%c0_7, %c128] : memref<1x2688xf32, #tpu.memory_space<vmem>>, vector<1x128xf32>
    %cst_8 = arith.constant dense<0.000000e+00> : vector<8x128xf32>
    %10 = tpu.matmul %7, %8, %cst_8 {dimension_numbers = #tpu.dot_dimension_numbers<[1], [0], [0], [1], [0, 0, 1, 1], [], []>} : vector<8x128xf32>, vector<128x128xf32>, vector<8x128xf32> -> vector<8x128xf32>
    %11 = vector.broadcast %9 : vector<1x128xf32> to vector<8x128xf32>
    %12 = arith.addf %10, %11 : vector<8x128xf32>
    %cst_9 = arith.constant 0.000000e+00 : f32
    %13 = vector.broadcast %cst_9 : f32 to vector<8x128xf32>
    %14 = arith.maximumf %12, %13 : vector<8x128xf32>
    %c192 = arith.constant 192 : index
    %c0_10 = arith.constant 0 : index
    %15 = vector.load %arg1[%c192, %c0_10] : memref<576x128xf32, #tpu.memory_space<vmem>>, vector<128x128xf32>
    %c0_11 = arith.constant 0 : index
    %c256 = arith.constant 256 : index
    %16 = vector.load %arg2[%c0_11, %c256] : memref<1x2688xf32, #tpu.memory_space<vmem>>, vector<1x128xf32>
    %cst_12 = arith.constant dense<0.000000e+00> : vector<8x128xf32>
    %17 = tpu.matmul %14, %15, %cst_12 {dimension_numbers = #tpu.dot_dimension_numbers<[1], [0], [0], [1], [0, 0, 1, 1], [], []>} : vector<8x128xf32>, vector<128x128xf32>, vector<8x128xf32> -> vector<8x128xf32>
    %18 = vector.broadcast %16 : vector<1x128xf32> to vector<8x128xf32>
    %19 = arith.addf %17, %18 : vector<8x128xf32>
    %cst_13 = arith.constant 0.000000e+00 : f32
    %20 = vector.broadcast %cst_13 : f32 to vector<8x128xf32>
    %21 = arith.maximumf %19, %20 : vector<8x128xf32>
    %c320 = arith.constant 320 : index
    %c0_14 = arith.constant 0 : index
    %22 = vector.load %arg1[%c320, %c0_14] : memref<576x128xf32, #tpu.memory_space<vmem>>, vector<128x128xf32>
    %c0_15 = arith.constant 0 : index
    %c384 = arith.constant 384 : index
    %23 = vector.load %arg2[%c0_15, %c384] : memref<1x2688xf32, #tpu.memory_space<vmem>>, vector<1x128xf32>
    %cst_16 = arith.constant dense<0.000000e+00> : vector<8x128xf32>
    %24 = tpu.matmul %21, %22, %cst_16 {dimension_numbers = #tpu.dot_dimension_numbers<[1], [0], [0], [1], [0, 0, 1, 1], [], []>} : vector<8x128xf32>, vector<128x128xf32>, vector<8x128xf32> -> vector<8x128xf32>
    %25 = vector.broadcast %23 : vector<1x128xf32> to vector<8x128xf32>
    %26 = arith.addf %24, %25 : vector<8x128xf32>
    %cst_17 = arith.constant 0.000000e+00 : f32
    %27 = vector.broadcast %cst_17 : f32 to vector<8x128xf32>
    %28 = arith.maximumf %26, %27 : vector<8x128xf32>
    %c448 = arith.constant 448 : index
    %c0_18 = arith.constant 0 : index
    %29 = vector.load %arg1[%c448, %c0_18] : memref<576x128xf32, #tpu.memory_space<vmem>>, vector<128x128xf32>
    %cst_19 = arith.constant dense<0.000000e+00> : vector<8x128xf32>
    %30 = tpu.matmul %28, %29, %cst_19 {dimension_numbers = #tpu.dot_dimension_numbers<[1], [0], [0], [1], [0, 0, 1, 1], [], []>} : vector<8x128xf32>, vector<128x128xf32>, vector<8x128xf32> -> vector<8x128xf32>
    %c0_20 = arith.constant 0 : index
    %c512 = arith.constant 512 : index
    %31 = vector.load %arg2[%c0_20, %c512] : memref<1x2688xf32, #tpu.memory_space<vmem>>, vector<1x128xf32>
    %32 = vector.broadcast %31 : vector<1x128xf32> to vector<8x128xf32>
    %33 = arith.addf %30, %32 : vector<8x128xf32>
    %c0_21 = arith.constant 0 : index
    %c0_22 = arith.constant 0 : index
    %34 = vector.load %arg5[%c0_21, %c0_22] : memref<8x128xf32, #tpu.memory_space<vmem>>, vector<8x128xf32>
    tpu.vector_store %arg5[%c0_21, %c0_22], %33 {strides = array<i32>} : memref<8x128xf32, #tpu.memory_space<vmem>>, vector<8x128xf32>,
    %35 = arith.truncf %28 : vector<8x128xf32> to vector<8x128xbf16>
    %36 = vector.extract_strided_slice %35 {offsets = [0, 0], sizes = [8, 64], strides = [1, 1]} : vector<8x128xbf16> to vector<8x64xbf16>
    %c0_23 = arith.constant 0 : index
    %c0_24 = arith.constant 0 : index
    %37 = vector.load %arg3[%c0_23, %c0_24] : memref<64x2048xbf16, #tpu.memory_space<vmem>>, vector<64x2048xbf16>
    %cst_25 = arith.constant dense<0.000000e+00> : vector<8x2048xf32>
    %38 = tpu.matmul %36, %37, %cst_25 {dimension_numbers = #tpu.dot_dimension_numbers<[1], [0], [0], [1], [0, 0, 1, 1], [], []>} : vector<8x64xbf16>, vector<64x2048xbf16>, vector<8x2048xf32> -> vector<8x2048xf32>
    %c0_26 = arith.constant 0 : index
    %c640 = arith.constant 640 : index
    %39 = vector.load %arg2[%c0_26, %c640] : memref<1x2688xf32, #tpu.memory_space<vmem>>, vector<1x2048xf32>
    %40 = vector.broadcast %39 : vector<1x2048xf32> to vector<8x2048xf32>
    %41 = arith.addf %38, %40 : vector<8x2048xf32>
    %c0_27 = arith.constant 0 : index
    %c0_28 = arith.constant 0 : index
    %42 = vector.load %arg4[%c0_27, %c0_28] : memref<8x2048xf32, #tpu.memory_space<vmem>>, vector<8x2048xf32>
    tpu.vector_store %arg4[%c0_27, %c0_28], %41 {strides = array<i32>} : memref<8x2048xf32, #tpu.memory_space<vmem>>, vector<8x2048xf32>,
    return
  }
}

</mosaic_0001>

<bundles_post_ra>
// kernel: tpu_custom_call.1
= control target key start
LH: loop header
LB: loop body
LE: loop exit
PB: predicated region body
PF: predicated region fallthrough
CT: control target
= control target key end

     0   :  { %11 = vsyncpa [#allocation3], 0  ;;  %s2172_s0 = inlined_call_operand.hbm [shape: f32[8,64], index: 0, kind: input, shape index: {}]   ;;  %s2173_s1 = inlined_call_operand.hbm [shape: f32[576,128], index: 1, kind: input, shape index: {}]   ;;  %s2174_s2 = inlined_call_operand.hbm [shape: f32[1,2688], index: 2, kind: input, shape index: {}]   ;;  %s2175_s3 = inlined_call_operand.hbm [shape: bf16[64,2048], index: 3, kind: input, shape index: {}]   ;;  %s2176_s4 = inlined_call_operand.hbm [shape: f32[8,2048], index: 4, kind: output, shape index: {0}]   ;;  %s2177_s5 = inlined_call_operand.hbm [shape: f32[8,128], index: 5, kind: output, shape index: {1}]  }
   0x1   :  { %12 = vsyncpa [#allocation6], 0 }
   0x2   :  { %13 = vsyncpa [#allocation9], 0 }
   0x3   :  { %14 = vsyncpa [#allocation4], 0 }
   0x4   :  { %15 = vsyncpa [#allocation12], 0  ;;  %s1965_s18 = smov [#allocation5]   ;;  %s1823_s22 = scalar_lea.hbm %s2173_s1, 9216 }
   0x5   :  { %s31_s19 = sshll.u32 %s1965_s18, 4  ;;  %p1824_p0 = scmp.ne.s32.totalorder %s2173_s1, %s1823_s22  ;;  %s32_s19 = int_to_ptr.vmem [resolvable:$true] %s31_s19 }
   0x6   :  { %p1827_p1 = scmp.lt.u32.totalorder %s1823_s22, %s2173_s1 }
   0x8   :  { %p1829_p2 = pnand %p1827_p1, %p1824_p0 }
   0xa   :  { %1832 = shalt.err (!%p1829_p2)
}
   0xb   :  { %s1833_s27 = scalar_lea.vmem %s32_s19, 9216  ;;  %p1838_p4 = scmp.lt.s32.totalorder %s32_s19, %s32_s19 }
   0xc   :  { %p1834_p3 = scmp.ne.s32.totalorder %s32_s19, %s1833_s27  ;;  %p1839_p5 = scmp.lt.s32.totalorder %s1833_s27, %s1833_s27 }
   0xe   :  { %p1840_p6 = por %p1839_p5, %p1838_p4 }
  0x10   :  { %p1841_p7 = pnand %p1840_p6, %p1834_p3 }
  0x12   :  { %1844 = shalt.err (!%p1841_p7)
}
  0x13   :  { %s1966_s28 = smov 128   ;;  %s1967_s29 = smov 8  }
  0x14   :  { %37 = dma.hbm_to_vmem [thread:$0]  %s2173_s1, 9216, %s32_s19, [#allocation6], %s1966_s28, %s1966_s28, %s1967_s29  }
  0x15   :  { %s1968_s7 = smov [#allocation2]   ;;  %s1969_s9 = smov [#allocation7]  }
  0x16   :  { %s22_s8 = sshll.u32 %s1968_s7, 4  ;;  %s44_s10 = sshll.u32 %s1969_s9, 4  ;;  %s23_s8 = int_to_ptr.vmem [resolvable:$true] %s22_s8  ;;  %s45_s10 = int_to_ptr.vmem [resolvable:$true] %s44_s10 }
  0x17   :  { %s1845_s13 = scalar_lea.hbm %s2172_s0, 128 }
  0x18   :  { %p1846_p8 = scmp.ne.s32.totalorder %s2172_s0, %s1845_s13  ;;  %p1849_p9 = scmp.lt.u32.totalorder %s1845_s13, %s2172_s0 }
  0x1a   :  { %p1851_p10 = pnand %p1849_p9, %p1846_p8 }
  0x1c   :  { %1854 = shalt.err (!%p1851_p10)
}
  0x1d   :  { %s1855_s1 = scalar_lea.vmem %s23_s8, 128  ;;  %p1860_p12 = scmp.lt.s32.totalorder %s23_s8, %s23_s8 }
  0x1e   :  { %p1856_p11 = scmp.ne.s32.totalorder %s23_s8, %s1855_s1  ;;  %p1861_p13 = scmp.lt.s32.totalorder %s1855_s1, %s1855_s1 }
  0x20   :  { %p1862_p0 = por %p1861_p13, %p1860_p12 }
  0x22   :  { %p1863_p1 = pnand %p1862_p0, %p1856_p11 }
  0x24   :  { %1866 = shalt.err (!%p1863_p1)
}
  0x25   :  { %25 = dma.hbm_to_vmem [thread:$0]  %s2172_s0, 128, %s23_s8, [#allocation3]  }
  0x26   :  { %s1867_s22 = scalar_lea.hbm %s2174_s2, 336 }
  0x27   :  { %p1868_p2 = scmp.ne.s32.totalorder %s2174_s2, %s1867_s22  ;;  %p1871_p3 = scmp.lt.u32.totalorder %s1867_s22, %s2174_s2 }
  0x29   :  { %p1873_p4 = pnand %p1871_p3, %p1868_p2 }
  0x2b   :  { %1876 = shalt.err (!%p1873_p4)
}
  0x2c   :  { %s1877_s27 = scalar_lea.vmem %s45_s10, 336  ;;  %s1881_s28 = scalar_lea.vmem %s45_s10, 352 }
  0x2d   :  { %p1878_p5 = scmp.ne.s32.totalorder %s45_s10, %s1877_s27  ;;  %p1882_p6 = scmp.lt.s32.totalorder %s45_s10, %s45_s10 }
  0x2e   :  { %p1883_p7 = scmp.lt.s32.totalorder %s1881_s28, %s1877_s27 }
  0x30   :  { %p1884_p8 = por %p1883_p7, %p1882_p6 }
  0x32   :  { %p1885_p9 = pnand %p1884_p8, %p1878_p5 }
  0x34   :  { %1888 = shalt.err (!%p1885_p9)
}
  0x35   :  { %47 = dma.hbm_to_vmem [thread:$0]  %s2174_s2, 336, %s45_s10, [#allocation6]  }
  0x36   :  { %s1970_s30 = smov [#allocation8]   ;;  %s1889_s9 = scalar_lea.hbm %s2175_s3, 8192 }
  0x37   :  { %s53_s6 = sshll.u32 %s1970_s30, 4  ;;  %p1890_p10 = scmp.ne.s32.totalorder %s2175_s3, %s1889_s9  ;;  %s54_s6 = int_to_ptr.vmem [resolvable:$true] %s53_s6 }
  0x38   :  { %p1893_p11 = scmp.lt.u32.totalorder %s1889_s9, %s2175_s3 }
  0x3a   :  { %p1895_p12 = pnand %p1893_p11, %p1890_p10 }
  0x3c   :  { %1898 = shalt.err (!%p1895_p12)
}
  0x3d   :  { %s1899_s15 = scalar_lea.vmem %s54_s6, 8192  ;;  %p1904_p0 = scmp.lt.s32.totalorder %s54_s6, %s54_s6 }
  0x3e   :  { %p1900_p13 = scmp.ne.s32.totalorder %s54_s6, %s1899_s15  ;;  %p1905_p1 = scmp.lt.s32.totalorder %s1899_s15, %s1899_s15 }
  0x40   :  { %p1906_p2 = por %p1905_p1, %p1904_p0 }
  0x42   :  { %p1907_p3 = pnand %p1906_p2, %p1900_p13 }
  0x44   :  { %1910 = shalt.err (!%p1907_p3)
}
  0x45   :  { %s1971_s2 = smov 1024   ;;  %s1972_s10 = smov 64  }
  0x46   :  { %59 = dma.hbm_to_vmem [thread:$0]  %s2175_s3, 8192, %s54_s6, [#allocation9], %s1971_s2, %s1971_s2, %s1972_s10  }
  0x47   :  { %1955 = dma.done.wait [#allocation3], 128  }
  0x48   :  { %1956 = vsyncadd [#allocation3], 4294967168 }
  0x49   :  { %1957 = dma.done.wait [#allocation6], 9552  }
  0x4a   :  { %1958 = vsyncadd [#allocation6], 4294957744 }
  0x4b   :  { %1959 = dma.done.wait [#allocation9], 8192  }
  0x4c   :  { %1960 = vsyncadd [#allocation9], 4294959104  ;;  %v1973_v0 = vmov 0.0|0.0   ;;  %vm1974_vm0 = vmmov 0   ;;  %v1975_v1 = vmov 0.0   ;;  %v74_v2 = vld [vmem:[#allocation5] sm:$0xff] }
  0x4d   :  { %1701 = vmatprep.subr.bf16.mxu0 %v1973_v0  ;;  %1558 = vmatprep.mubr.msk.f32.mxu0 %vm1974_vm0, %v1975_v1  ;;  %v75_v3 = vld [vmem:[#allocation5 + $0x8] sm:$0xff]  ;;  %v76_v4 = vld [vmem:[#allocation5 + $0x10] sm:$0xff]  ;;  %v77_v6 = vld [vmem:[#allocation5 + $0x18] sm:$0xff]  ;;  %vm89_vm1 = vcmask 523264   ;;  %s1977_s3 = smov [#allocation11]  }
  0x4e   :  { %1713 = vmatprep.subr.bf16.mxu1 %v1973_v0  ;;  %1593 = vmatprep.mubr.msk.f32.mxu1 %vm1974_vm0, %v1975_v1  ;;  %v1702_v5 = vpack.c.bf16 %v75_v3, %v74_v2  ;;  %v1705_v7 = vpack.c.bf16 %v77_v6, %v76_v4  ;;  %v164_v8 = vld [vmem:[#allocation5 + $0x40] sm:$0xff]  ;;  %v165_v9 = vld [vmem:[#allocation5 + $0x48] sm:$0xff]  ;;  %v166_v10 = vld [vmem:[#allocation5 + $0x50] sm:$0xff]  ;;  %s1372_s1 = sshll.u32 %s1977_s3, 4  ;;  %s1373_s1 = int_to_ptr.vmem [resolvable:$true] %s1372_s1 }
  0x4f   :  { %v78_v11 = vld [vmem:[#allocation5 + $0x20] sm:$0xff]  ;;  %v79_v12 = vld [vmem:[#allocation5 + $0x28] sm:$0xff]  ;;  %v1714_v13 = vpack.c.bf16 %v165_v9, %v164_v8  ;;  %v167_v14 = vld [vmem:[#allocation5 + $0x58] sm:$0xff]  ;;  %s1911_s18 = scalar_lea.vmem %s1373_s1, 128  ;;  %p1916_p5 = scmp.lt.s32.totalorder %s1373_s1, %s1373_s1 }
  0x50   :  { %1703 = vmatpush3.bf16.msra.mxu0 %v1702_v5  ;;  %v1717_v15 = vpack.c.bf16 %v167_v14, %v166_v10  ;;  %v1708_v16 = vpack.c.bf16 %v79_v12, %v78_v11  ;;  %v168_v17 = vld [vmem:[#allocation5 + $0x60] sm:$0xff]  ;;  %v169_v18 = vld [vmem:[#allocation5 + $0x68] sm:$0xff]  ;;  %v80_v19 = vld [vmem:[#allocation5 + $0x30] sm:$0xff]  ;;  %p1912_p4 = scmp.ne.s32.totalorder %s1373_s1, %s1911_s18  ;;  %p1917_p6 = scmp.lt.s32.totalorder %s1911_s18, %s1911_s18 }
  0x51   :  { %1704 = vmatprep.subr.bf16.mxu0 %v1973_v0  ;;  %1715 = vmatpush3.bf16.msra.mxu1 %v1714_v13  ;;  %v81_v20 = vld [vmem:[#allocation5 + $0x38] sm:$0xff]  ;;  %v1720_v21 = vpack.c.bf16 %v169_v18, %v168_v17  ;;  %v170_v23 = vld [vmem:[#allocation5 + $0x70] sm:$0xff]  ;;  %v172_v27 = vld [vmem:[#allocation5 + $0x80] sm:$0xff] }
  0x52   :  { %1716 = vmatprep.subr.bf16.mxu1 %v1973_v0  ;;  %v1711_v22 = vpack.c.bf16 %v81_v20, %v80_v19  ;;  %v171_v24 = vld [vmem:[#allocation5 + $0x78] sm:$0xff]  ;;  %v173_v28 = vld [vmem:[#allocation5 + $0x88] sm:$0xff]  ;;  %v174_v30 = vld [vmem:[#allocation5 + $0x90] sm:$0xff]  ;;  %p1918_p7 = por %p1917_p6, %p1916_p5 }
  0x53   :  { %v1723_v25 = vpack.c.bf16 %v171_v24, %v170_v23  ;;  %v73_v26 = vld [vmem:[#allocation2] sm:$0xff]  ;;  %v1726_v29 = vpack.c.bf16 %v173_v28, %v172_v27  ;;  %v176_v33 = vld [vmem:[#allocation5 + $0xa0] sm:$0xff]  ;;  %v177_v34 = vld [vmem:[#allocation5 + $0xa8] sm:$0xff] }
  0x54   :  { %1706 = vmatpush3.bf16.msra.mxu0 %v1705_v7  ;;  %v175_v31 = vld [vmem:[#allocation5 + $0x98] sm:$0xff]  ;;  %v1732_v35 = vpack.c.bf16 %v177_v34, %v176_v33  ;;  %v178_v36 = vld [vmem:[#allocation5 + $0xb0] sm:$0xff]  ;;  %v258_v39 = vld [vmem:[#allocation5 + $0xc0] sm:$0xff]  ;;  %p1919_p8 = pnand %p1918_p7, %p1912_p4 }
  0x55   :  { %1707 = vmatprep.subr.bf16.mxu0 %v1973_v0  ;;  %1718 = vmatpush3.bf16.msra.mxu1 %v1717_v15  ;;  %v1729_v32 = vpack.c.bf16 %v175_v31, %v174_v30  ;;  %v179_v37 = vld [vmem:[#allocation5 + $0xb8] sm:$0xff]  ;;  %v259_v40 = vld [vmem:[#allocation5 + $0xc8] sm:$0xff]  ;;  %v260_v41 = vld [vmem:[#allocation5 + $0xd0] sm:$0xff] }
  0x56   :  { %1719 = vmatprep.subr.bf16.mxu1 %v1973_v0  ;;  %v1735_v38 = vpack.c.bf16 %v179_v37, %v178_v36  ;;  %v1738_v42 = vpack.c.bf16 %v259_v40, %v258_v39  ;;  %v261_v43 = vld [vmem:[#allocation5 + $0xd8] sm:$0xff]  ;;  %v262_v45 = vld [vmem:[#allocation5 + $0xe0] sm:$0xff]  ;;  %v263_v46 = vld [vmem:[#allocation5 + $0xe8] sm:$0xff] }
  0x57   :  { %v1741_v44 = vpack.c.bf16 %v261_v43, %v260_v41  ;;  %v1744_v47 = vpack.c.bf16 %v263_v46, %v262_v45  ;;  %v264_v48 = vld [vmem:[#allocation5 + $0xf0] sm:$0xff]  ;;  %v265_v49 = vld [vmem:[#allocation5 + $0xf8] sm:$0xff]  ;;  %v266_v51 = vld [vmem:[#allocation5 + $0x100] sm:$0xff] }
  0x58   :  { %1709 = vmatpush3.bf16.msra.mxu0 %v1708_v16  ;;  %v1747_v50 = vpack.c.bf16 %v265_v49, %v264_v48  ;;  %v267_v52 = vld [vmem:[#allocation5 + $0x108] sm:$0xff]  ;;  %v268_v54 = vld [vmem:[#allocation5 + $0x110] sm:$0xff]  ;;  %v269_v55 = vld [vmem:[#allocation5 + $0x118] sm:$0xff] }
  0x59   :  { %1710 = vmatprep.subr.bf16.mxu0 %v1973_v0  ;;  %1721 = vmatpush3.bf16.msra.mxu1 %v1720_v21  ;;  %v1750_v53 = vpack.c.bf16 %v267_v52, %v266_v51  ;;  %v1753_v56 = vpack.c.bf16 %v269_v55, %v268_v54  ;;  %v270_v57 = vld [vmem:[#allocation5 + $0x120] sm:$0xff]  ;;  %v271_v58 = vld [vmem:[#allocation5 + $0x128] sm:$0xff]  ;;  %v272_v3 = vld [vmem:[#allocation5 + $0x130] sm:$0xff] }
  0x5a   :  { %1722 = vmatprep.subr.bf16.mxu1 %v1973_v0  ;;  %v1756_v59 = vpack.c.bf16 %v271_v58, %v270_v57  ;;  %v1387_v60 = vld [vmem:[#allocation7] ss:$0 sm:$0xff]  ;;  %v273_v4 = vld [vmem:[#allocation5 + $0x138] sm:$0xff]  ;;  %v353_v7 = vld [vmem:[#allocation5 + $0x148] sm:$0xff] }
  0x5b   :  { %v1759_v5 = vpack.c.bf16 %v273_v4, %v272_v3  ;;  %v352_v6 = vld [vmem:[#allocation5 + $0x140] sm:$0xff]  ;;  %v354_v8 = vld [vmem:[#allocation5 + $0x150] sm:$0xff]  ;;  %v355_v10 = vld [vmem:[#allocation5 + $0x158] sm:$0xff] }
  0x5c   :  { %1712 = vmatpush3.bf16.msra.mxu0 %v1711_v22  ;;  %v1762_v9 = vpack.c.bf16 %v353_v7, %v352_v6  ;;  %v1765_v11 = vpack.c.bf16 %v355_v10, %v354_v8  ;;  %v356_v12 = vld [vmem:[#allocation5 + $0x160] sm:$0xff]  ;;  %v357_v13 = vld [vmem:[#allocation5 + $0x168] sm:$0xff]  ;;  %v358_v15 = vld [vmem:[#allocation5 + $0x170] sm:$0xff] }
  0x5d   :  { %1737 = vmatprep.subr.bf16.mxu0 %v1973_v0  ;;  %1724 = vmatpush3.bf16.msra.mxu1 %v1723_v25  ;;  %v1768_v14 = vpack.c.bf16 %v357_v13, %v356_v12  ;;  %v359_v16 = vld [vmem:[#allocation5 + $0x178] sm:$0xff]  ;;  %v360_v18 = vld [vmem:[#allocation5 + $0x180] sm:$0xff]  ;;  %v361_v19 = vld [vmem:[#allocation5 + $0x188] sm:$0xff] }
  0x5e   :  { %1725 = vmatprep.subr.bf16.mxu1 %v1973_v0  ;;  %v1771_v17 = vpack.c.bf16 %v359_v16, %v358_v15  ;;  %v1774_v20 = vpack.c.bf16 %v361_v19, %v360_v18  ;;  %v362_v21 = vld [vmem:[#allocation5 + $0x190] sm:$0xff]  ;;  %v363_v22 = vld [vmem:[#allocation5 + $0x198] sm:$0xff]  ;;  %v364_v24 = vld [vmem:[#allocation5 + $0x1a0] sm:$0xff] }
  0x5f   :  { %1559 = vmatmul.mubr.msk.f32.vlgmr.msra.gmra.mrb[0].mxu0 %vm89_vm1, %v73_v26  ;;  %v1777_v23 = vpack.c.bf16 %v363_v22, %v362_v21  ;;  %v365_v25 = vld [vmem:[#allocation5 + $0x1a8] sm:$0xff]  ;;  %v1389_v27 = vld [vmem:[#allocation7 + $0x1] ss:$0 sm:$0xff]  ;;  %v367_v33 = vld [vmem:[#allocation5 + $0x1b8] sm:$0xff] }
  0x60   :  { %1628 = vmatprep.mubr.msk.f32.mxu0 %vm1974_vm0, %v1975_v1  ;;  %1739 = vmatpush3.bf16.msra.mxu0 %v1738_v42  ;;  %v1780_v26 = vpack.c.bf16 %v365_v25, %v364_v24  ;;  %v447_v36 = vld [vmem:[#allocation5 + $0x1c8] sm:$0xff]  ;;  %v448_v37 = vld [vmem:[#allocation5 + $0x1d0] sm:$0xff]  ;;  %v449_v39 = vld [vmem:[#allocation5 + $0x1d8] sm:$0xff]  ;;  %v1976_v24 = vmov 0  }
  0x61   :  { %1727 = vmatpush3.bf16.msra.mxu1 %v1726_v29  ;;  %1740 = vmatprep.subr.bf16.mxu0 %v1973_v0  ;;  %v1789_v40 = vpack.c.bf16 %v449_v39, %v448_v37  ;;  %v541_v41 = vld [vmem:[#allocation8] sm:$0xff]  ;;  %v450_v43 = vld [vmem:[#allocation5 + $0x1e0] sm:$0xff]  ;;  %v455_v51 = vld [vmem:[#allocation5 + $0x208] sm:$0xff] }
  0x62   :  { %1728 = vmatprep.subr.bf16.mxu1 %v1973_v0  ;;  %v549_v42 = vld [vmem:[#allocation8 + $0x40] sm:$0xff]  ;;  %v459_v57 = vld [vmem:[#allocation5 + $0x228] sm:$0xff]  ;;  %v542_v16 = vld [vmem:[#allocation8 + $0x8] sm:$0xff] }
  0x63   :  { %v1393_v45 = vcombine.low %v541_v41, %v549_v42  ;;  %v1394_v46 = vcombine.high %v541_v41, %v549_v42  ;;  %v453_v48 = vld [vmem:[#allocation5 + $0x1f8] sm:$0xff]  ;;  %v551_v21 = vld [vmem:[#allocation8 + $0x50] sm:$0xff]  ;;  %v1391_v25 = vld [vmem:[#allocation7 + $0x3] ss:$0 sm:$0xff] }
  0x64   :  { %1742 = vmatpush3.bf16.msra.mxu0 %v1741_v44  ;;  %v451_v44 = vld [vmem:[#allocation5 + $0x1e8] sm:$0xff]  ;;  %v457_v54 = vld [vmem:[#allocation5 + $0x218] sm:$0xff] }
  0x65   :  { %1730 = vmatpush3.bf16.msra.mxu1 %v1729_v32  ;;  %1743 = vmatprep.subr.bf16.mxu0 %v1973_v0  ;;  %v366_v32 = vld [vmem:[#allocation5 + $0x1b0] sm:$0xff]  ;;  %v461_v10 = vld [vmem:[#allocation5 + $0x238] sm:$0xff]  ;;  %v583_v41 = vld [vmem:[#allocation8 + $0x150] sm:$0xff] }
  0x66   :  { %1731 = vmatprep.subr.bf16.mxu1 %v1973_v0  ;;  %v1783_v34 = vpack.c.bf16 %v367_v33, %v366_v32  ;;  %v581_v6 = vld [vmem:[#allocation8 + $0x140] sm:$0xff]  ;;  %v567_v32 = vld [vmem:[#allocation8 + $0xd0] sm:$0xff] }
  0x67   :  { %v589_v12 = vld [vmem:[#allocation8 + $0x180] sm:$0xff] }
  0x68   :  { %1745 = vmatpush3.bf16.msra.mxu0 %v1744_v47  ;;  %v452_v47 = vld [vmem:[#allocation5 + $0x1f0] sm:$0xff] }
  0x69   :  { %1733 = vmatpush3.bf16.msra.mxu1 %v1732_v35  ;;  %1746 = vmatprep.subr.bf16.mxu0 %v1973_v0  ;;  %v446_v35 = vld [vmem:[#allocation5 + $0x1c0] sm:$0xff]  ;;  %v1795_v49 = vpack.c.bf16 %v453_v48, %v452_v47  ;;  %v597_v13 = vld [vmem:[#allocation8 + $0x1c0] sm:$0xff] }
  0x6a   :  { %1734 = vmatprep.subr.bf16.mxu1 %v1973_v0  ;;  %v1441_v15 = vcombine.low %v589_v12, %v597_v13  ;;  %v591_v47 = vld [vmem:[#allocation8 + $0x190] sm:$0xff] }
  0x6b   :  { %v599_v48 = vld [vmem:[#allocation8 + $0x1d0] sm:$0xff] }
  0x6c   :  { %1748 = vmatpush3.bf16.msra.mxu0 %v1747_v50  ;;  %v454_v50 = vld [vmem:[#allocation5 + $0x200] sm:$0xff] }
  0x6d   :  { %1736 = vmatpush3.bf16.msra.mxu1 %v1735_v38  ;;  %1749 = vmatprep.subr.bf16.mxu0 %v1973_v0  ;;  %v1786_v38 = vpack.c.bf16 %v447_v36, %v446_v35  ;;  %v1798_v52 = vpack.c.bf16 %v455_v51, %v454_v50  ;;  %v574_v35 = vld [vmem:[#allocation8 + $0x108] sm:$0xff]  ;;  %v544_v51 = vld [vmem:[#allocation8 + $0x18] sm:$0xff] }
  0x6e   :  { %1761 = vmatprep.subr.bf16.mxu1 %v1973_v0  ;;  %v582_v36 = vld [vmem:[#allocation8 + $0x148] sm:$0xff] }
  0x6f   :  { %v1428_v42 = vcombine.high %v574_v35, %v582_v36 }
  0x70   :  { %1751 = vmatpush3.bf16.msra.mxu0 %v1750_v53  ;;  %v456_v53 = vld [vmem:[#allocation5 + $0x210] sm:$0xff] }
  0x71   :  { %1752 = vmatprep.subr.bf16.mxu0 %v1973_v0  ;;  %v1801_v55 = vpack.c.bf16 %v457_v54, %v456_v53  ;;  %v1446_v53 = vcombine.high %v591_v47, %v599_v48 }
  0x74   :  { %1754 = vmatpush3.bf16.msra.mxu0 %v1753_v56  ;;  %v458_v56 = vld [vmem:[#allocation5 + $0x220] sm:$0xff] }
  0x75   :  { %1755 = vmatprep.subr.bf16.mxu0 %v1973_v0  ;;  %v1804_v58 = vpack.c.bf16 %v459_v57, %v458_v56  ;;  %v553_v56 = vld [vmem:[#allocation8 + $0x60] sm:$0xff] }
  0x78   :  { %1757 = vmatpush3.bf16.msra.mxu0 %v1756_v59  ;;  %v1390_v59 = vld [vmem:[#allocation7 + $0x2] ss:$0 sm:$0xff] }
  0x79   :  { %1758 = vmatprep.subr.bf16.mxu0 %v1973_v0 }
  0x7c   :  { %1760 = vmatpush3.bf16.msra.mxu0 %v1759_v5  ;;  %v573_v5 = vld [vmem:[#allocation8 + $0x100] sm:$0xff] }
  0x7d   :  { %1785 = vmatprep.subr.bf16.mxu0 %v1973_v0  ;;  %v1426_v8 = vcombine.high %v573_v5, %v581_v6 }
 0x132   :  { %v159_v61 = vpop.f32.mrb[0].mxu0 }
 0x133   :  { %v160_v62 = vadd.f32 %v1387_v60, %v159_v61  ;;  %v1560_v63 = vpop.f32.mrb[1].mxu0  ;;  %v557_v61 = vld [vmem:[#allocation8 + $0x80] sm:$0xff] }
 0x135   :  { %v163_v2 = vmax.f32 %v160_v62, 0.0  ;;  %v565_v62 = vld [vmem:[#allocation8 + $0xc0] sm:$0xff] }
 0x136   :  { %v1410_v4 = vcombine.high %v557_v61, %v565_v62  ;;  %v1409_v7 = vcombine.low %v557_v61, %v565_v62 }
 0x137   :  { %1594 = vmatmul.mubr.f32.vlgmr.msra.gmra.mrb[0].mxu1 %v163_v2 }
 0x138   :  { %1663 = vmatprep.mubr.msk.f32.mxu1 %vm1974_vm0, %v1975_v1  ;;  %1763 = vmatpush3.bf16.msra.mxu1 %v1762_v9  ;;  %v1425_v9 = vcombine.low %v573_v5, %v581_v6  ;;  %v576_v5 = vld [vmem:[#allocation8 + $0x118] sm:$0xff] }
 0x139   :  { %1764 = vmatprep.subr.bf16.mxu1 %v1973_v0  ;;  %v584_v6 = vld [vmem:[#allocation8 + $0x158] sm:$0xff] }
 0x13c   :  { %1766 = vmatpush3.bf16.msra.mxu1 %v1765_v11 }
 0x13d   :  { %1767 = vmatprep.subr.bf16.mxu1 %v1973_v0 }
 0x140   :  { %1769 = vmatpush3.bf16.msra.mxu1 %v1768_v14  ;;  %v1442_v14 = vcombine.high %v589_v12, %v597_v13  ;;  %v592_v12 = vld [vmem:[#allocation8 + $0x198] sm:$0xff] }
 0x141   :  { %1770 = vmatprep.subr.bf16.mxu1 %v1973_v0  ;;  %v600_v13 = vld [vmem:[#allocation8 + $0x1d8] sm:$0xff] }
 0x144   :  { %1772 = vmatpush3.bf16.msra.mxu1 %v1771_v17  ;;  %v550_v17 = vld [vmem:[#allocation8 + $0x48] sm:$0xff] }
 0x145   :  { %1773 = vmatprep.subr.bf16.mxu1 %v1973_v0  ;;  %v1396_v18 = vcombine.high %v542_v16, %v550_v17  ;;  %v1395_v19 = vcombine.low %v542_v16, %v550_v17  ;;  %v593_v16 = vld [vmem:[#allocation8 + $0x1a0] sm:$0xff] }
 0x146   :  { %v601_v17 = vld [vmem:[#allocation8 + $0x1e0] sm:$0xff] }
 0x148   :  { %1775 = vmatpush3.bf16.msra.mxu1 %v1774_v20  ;;  %v543_v20 = vld [vmem:[#allocation8 + $0x10] sm:$0xff] }
 0x149   :  { %1776 = vmatprep.subr.bf16.mxu1 %v1973_v0  ;;  %v1398_v22 = vcombine.high %v543_v20, %v551_v21 }
 0x14c   :  { %1778 = vmatpush3.bf16.msra.mxu1 %v1777_v23  ;;  %v1397_v23 = vcombine.low %v543_v20, %v551_v21  ;;  %v546_v20 = vld [vmem:[#allocation8 + $0x28] sm:$0xff] }
 0x14d   :  { %1779 = vmatprep.subr.bf16.mxu1 %v1973_v0  ;;  %v554_v21 = vld [vmem:[#allocation8 + $0x68] sm:$0xff] }
 0x150   :  { %1781 = vmatpush3.bf16.msra.mxu1 %v1780_v26 }
 0x151   :  { %1782 = vmatprep.subr.bf16.mxu1 %v1973_v0 }
 0x154   :  { %1784 = vmatpush3.bf16.msra.mxu1 %v1783_v34 }
 0x155   :  { %1012 = vmatprep.subr.bf16.mxu1 %v1394_v46 }
 0x20a   :  { %v253_v28 = vpop.f32.mrb[0].mxu1 }
 0x20b   :  { %v254_v29 = vadd.f32 %v1389_v27, %v253_v28  ;;  %v1595_v30 = vpop.f32.mrb[1].mxu1  ;;  %v558_v27 = vld [vmem:[#allocation8 + $0x88] sm:$0xff] }
 0x20c   :  { %v566_v28 = vld [vmem:[#allocation8 + $0xc8] sm:$0xff] }
 0x20d   :  { %v257_v31 = vmax.f32 %v254_v29, 0.0  ;;  %v1412_v34 = vcombine.high %v558_v27, %v566_v28  ;;  %v1411_v39 = vcombine.low %v558_v27, %v566_v28  ;;  %v1404_v27 = vcombine.high %v546_v20, %v554_v21 }
 0x20e   :  { %v1449_v28 = vcombine.low %v593_v16, %v601_v17 }
 0x20f   :  { %1629 = vmatmul.mubr.f32.vlgmr.msra.gmra.mrb[2].mxu0 %v257_v31  ;;  %v559_v31 = vld [vmem:[#allocation8 + $0x90] sm:$0xff] }
 0x210   :  { %1698 = vmatprep.mubr.msk.f32.mxu0 %vm1974_vm0, %v1975_v1  ;;  %1787 = vmatpush3.bf16.msra.mxu0 %v1786_v38  ;;  %v1792_v1 = vpack.c.bf16 %v451_v44, %v450_v43  ;;  %v1414_v38 = vcombine.high %v559_v31, %v567_v32  ;;  %v1413_v43 = vcombine.low %v559_v31, %v567_v32  ;;  %v590_v44 = vld [vmem:[#allocation8 + $0x188] sm:$0xff] }
 0x211   :  { %1788 = vmatprep.subr.bf16.mxu0 %v1973_v0  ;;  %v1403_v32 = vcombine.low %v546_v20, %v554_v21 }
 0x214   :  { %1790 = vmatpush3.bf16.msra.mxu0 %v1789_v40  ;;  %v575_v40 = vld [vmem:[#allocation8 + $0x110] sm:$0xff] }
 0x215   :  { %1791 = vmatprep.subr.bf16.mxu0 %v1973_v0  ;;  %v1430_v46 = vcombine.high %v575_v40, %v583_v41  ;;  %v1429_v50 = vcombine.low %v575_v40, %v583_v41 }
 0x218   :  { %1793 = vmatpush3.bf16.msra.mxu0 %v1792_v1  ;;  %v1427_v1 = vcombine.low %v574_v35, %v582_v36 }
 0x219   :  { %1794 = vmatprep.subr.bf16.mxu0 %v1973_v0 }
 0x21c   :  { %1796 = vmatpush3.bf16.msra.mxu0 %v1795_v49 }
 0x21d   :  { %1797 = vmatprep.subr.bf16.mxu0 %v1973_v0 }
 0x220   :  { %1799 = vmatpush3.bf16.msra.mxu0 %v1798_v52  ;;  %v552_v52 = vld [vmem:[#allocation8 + $0x58] sm:$0xff] }
 0x221   :  { %1800 = vmatprep.subr.bf16.mxu0 %v1973_v0  ;;  %v1400_v57 = vcombine.high %v544_v51, %v552_v52  ;;  %v1399_v62 = vcombine.low %v544_v51, %v552_v52 }
 0x224   :  { %1802 = vmatpush3.bf16.msra.mxu0 %v1801_v55  ;;  %v545_v55 = vld [vmem:[#allocation8 + $0x20] sm:$0xff] }
 0x225   :  { %1803 = vmatprep.subr.bf16.mxu0 %v1973_v0  ;;  %v1402_v61 = vcombine.high %v545_v55, %v553_v56 }
 0x228   :  { %1805 = vmatpush3.bf16.msra.mxu0 %v1804_v58  ;;  %v1445_v58 = vcombine.low %v591_v47, %v599_v48 }
 0x229   :  { %1806 = vmatprep.subr.bf16.mxu0 %v1973_v0  ;;  %v460_v0 = vld [vmem:[#allocation5 + $0x230] sm:$0xff] }
 0x22a   :  { %v1807_v11 = vpack.c.bf16 %v461_v10, %v460_v0  ;;  %v585_v0 = vld [vmem:[#allocation8 + $0x160] sm:$0xff]  ;;  %v1432_v10 = vcombine.high %v576_v5, %v584_v6 }
 0x22c   :  { %1808 = vmatpush3.bf16.msra.mxu0 %v1807_v11 }
 0x22d   :  { %1053 = vmatprep.subr.bf16.mxu0 %v1396_v18  ;;  %v1448_v18 = vcombine.high %v592_v12, %v600_v13 }
 0x2e2   :  { %v347_v60 = vpop.f32.mrb[2].mxu0 }
 0x2e3   :  { %v348_v63 = vadd.f32 %v1390_v59, %v347_v60  ;;  %v1630_v2 = vpop.f32.mrb[3].mxu0  ;;  %v560_v59 = vld [vmem:[#allocation8 + $0x98] sm:$0xff] }
 0x2e4   :  { %v568_v60 = vld [vmem:[#allocation8 + $0xd8] sm:$0xff]  ;;  %v569_v2 = vld [vmem:[#allocation8 + $0xe0] sm:$0xff] }
 0x2e5   :  { %v351_v3 = vmax.f32 %v348_v63, 0.0  ;;  %v561_v63 = vld [vmem:[#allocation8 + $0xa0] sm:$0xff] }
 0x2e6   :  { %v1417_v11 = vcombine.low %v561_v63, %v569_v2 }
 0x2e7   :  { %1664 = vmatmul.mubr.f32.vlgmr.msra.gmra.mrb[2].mxu1 %v351_v3  ;;  %v1416_v3 = vcombine.high %v560_v59, %v568_v60 }
 0x2e8   :  { %1013 = vmatpush1.bf16.msra.mxu1 %v1393_v45  ;;  %1044 = vmatprep.mubr.bf16.mxu1 %v1976_v24  ;;  %v598_v45 = vld [vmem:[#allocation8 + $0x1c8] sm:$0xff] }
 0x2e9   :  { %1014 = vmatprep.subr.bf16.mxu1 %v1410_v4  ;;  %v1444_v49 = vcombine.high %v590_v44, %v598_v45  ;;  %v1443_v54 = vcombine.low %v590_v44, %v598_v45  ;;  %v1401_v4 = vcombine.low %v545_v55, %v553_v56 }
 0x2ec   :  { %1015 = vmatpush1.bf16.msra.mxu1 %v1409_v7  ;;  %v1418_v7 = vcombine.high %v561_v63, %v569_v2  ;;  %v580_v63 = vld [vmem:[#allocation8 + $0x138] sm:$0xff] }
 0x2ed   :  { %1016 = vmatprep.subr.bf16.mxu1 %v1426_v8  ;;  %v1415_v8 = vcombine.low %v560_v59, %v568_v60  ;;  %v564_v59 = vld [vmem:[#allocation8 + $0xb8] sm:$0xff] }
 0x2ee   :  { %v572_v60 = vld [vmem:[#allocation8 + $0xf8] sm:$0xff] }
 0x2ef   :  { %v588_v2 = vld [vmem:[#allocation8 + $0x178] sm:$0xff] }
 0x2f0   :  { %1017 = vmatpush1.bf16.msra.mxu1 %v1425_v9  ;;  %v577_v9 = vld [vmem:[#allocation8 + $0x120] sm:$0xff] }
 0x2f1   :  { %1018 = vmatprep.subr.bf16.mxu1 %v1442_v14  ;;  %v1434_v14 = vcombine.high %v577_v9, %v585_v0 }
 0x2f4   :  { %1019 = vmatpush1.bf16.msra.mxu1 %v1441_v15  ;;  %v1431_v15 = vcombine.low %v576_v5, %v584_v6  ;;  %v596_v5 = vld [vmem:[#allocation8 + $0x1b8] sm:$0xff] }
 0x2f5   :  { %1094 = vmatprep.subr.bf16.mxu1 %v1398_v22  ;;  %v1450_v22 = vcombine.high %v593_v16, %v601_v17  ;;  %v604_v6 = vld [vmem:[#allocation8 + $0x1f8] sm:$0xff] }
 0x3ba   :  { %v441_v26 = vpop.f32.mrb[2].mxu1 }
 0x3bb   :  { %v442_v29 = vadd.f32 %v1391_v25, %v441_v26  ;;  %v1665_v30 = vpop.f32.mrb[3].mxu1  ;;  %v547_v25 = vld [vmem:[#allocation8 + $0x30] sm:$0xff] }
 0x3bc   :  { %v555_v26 = vld [vmem:[#allocation8 + $0x70] sm:$0xff]  ;;  %v570_v30 = vld [vmem:[#allocation8 + $0xe8] sm:$0xff] }
 0x3bd   :  { %v445_v33 = vmax.f32 %v442_v29, 0.0  ;;  %v562_v29 = vld [vmem:[#allocation8 + $0xa8] sm:$0xff]  ;;  %v1406_v31 = vcombine.high %v547_v25, %v555_v26  ;;  %v1405_v36 = vcombine.low %v547_v25, %v555_v26 }
 0x3be   :  { %v1420_v35 = vcombine.high %v562_v29, %v570_v30  ;;  %v1419_v41 = vcombine.low %v562_v29, %v570_v30 }
 0x3bf   :  { %v2105_v37 = vpack.c.bf16 %v445_v33, %v445_v33  ;;  %1699 = vmatmul.mubr.f32.vlgmr.msra.gmra.mrb[4].mxu0 %v445_v33  ;;  %v563_v33 = vld [vmem:[#allocation8 + $0xb0] sm:$0xff] }
 0x3c0   :  { %1054 = vmatpush1.bf16.msra.mxu0 %v1395_v19  ;;  %1085 = vmatprep.mubr.bf16.mxu0 %v1976_v24  ;;  %v1433_v19 = vcombine.low %v577_v9, %v585_v0  ;;  %v1455_v9 = vcombine.low %v596_v5, %v604_v6  ;;  %v609_v0 = vlaneseq }
 0x3c1   :  { %1457 = vmatmul.mubr.msk.bf16.vlgmr.msra.gmra.mrb[4].mxu1 %vm89_vm1, %v2105_v37  ;;  %1055 = vmatprep.subr.bf16.mxu0 %v1412_v34  ;;  %v571_v34 = vld [vmem:[#allocation8 + $0xf0] sm:$0xff] }
 0x3c2   :  { %1095 = vmatpush1.bf16.msra.mxu1 %v1397_v23  ;;  %1126 = vmatprep.mubr.bf16.mxu1 %v1976_v24  ;;  %v1447_v23 = vcombine.low %v592_v12, %v600_v13  ;;  %v1422_v40 = vcombine.high %v563_v33, %v571_v34  ;;  %v1421_v45 = vcombine.low %v563_v33, %v571_v34  ;;  %v1392_v13 = vld [vmem:[#allocation7 + $0x4] ss:$0 sm:$0xff] }
 0x3c3   :  { %1096 = vmatprep.subr.bf16.mxu1 %v1414_v38  ;;  %v578_v38 = vld [vmem:[#allocation8 + $0x128] sm:$0xff] }
 0x3c4   :  { %1056 = vmatpush1.bf16.msra.mxu0 %v1411_v39  ;;  %v586_v39 = vld [vmem:[#allocation8 + $0x168] sm:$0xff] }
 0x3c5   :  { %1057 = vmatprep.subr.bf16.mxu0 %v1428_v42  ;;  %v579_v42 = vld [vmem:[#allocation8 + $0x130] sm:$0xff]  ;;  %v1436_v44 = vcombine.high %v578_v38, %v586_v39  ;;  %v1435_v48 = vcombine.low %v578_v38, %v586_v39 }
 0x3c6   :  { %1097 = vmatpush1.bf16.msra.mxu1 %v1413_v43  ;;  %v587_v43 = vld [vmem:[#allocation8 + $0x170] sm:$0xff] }
 0x3c7   :  { %1098 = vmatprep.subr.bf16.mxu1 %v1430_v46  ;;  %v594_v46 = vld [vmem:[#allocation8 + $0x1a8] sm:$0xff]  ;;  %v1438_v47 = vcombine.high %v579_v42, %v587_v43  ;;  %v1437_v52 = vcombine.low %v579_v42, %v587_v43 }
 0x3c8   :  { %1058 = vmatpush1.bf16.msra.mxu0 %v1427_v1  ;;  %v602_v1 = vld [vmem:[#allocation8 + $0x1e8] sm:$0xff] }
 0x3c9   :  { %1059 = vmatprep.subr.bf16.mxu0 %v1444_v49  ;;  %v595_v49 = vld [vmem:[#allocation8 + $0x1b0] sm:$0xff]  ;;  %v1452_v51 = vcombine.high %v594_v46, %v602_v1  ;;  %v1451_v56 = vcombine.low %v594_v46, %v602_v1 }
 0x3ca   :  { %1099 = vmatpush1.bf16.msra.mxu1 %v1429_v50  ;;  %v603_v50 = vld [vmem:[#allocation8 + $0x1f0] sm:$0xff] }
 0x3cb   :  { %1100 = vmatprep.subr.bf16.mxu1 %v1446_v53  ;;  %v548_v53 = vld [vmem:[#allocation8 + $0x38] sm:$0xff]  ;;  %v1454_v55 = vcombine.high %v595_v49, %v603_v50 }
 0x3cc   :  { %1060 = vmatpush1.bf16.msra.mxu0 %v1443_v54  ;;  %v556_v54 = vld [vmem:[#allocation8 + $0x78] sm:$0xff] }
 0x3cd   :  { %1135 = vmatprep.subr.bf16.mxu0 %v1400_v57  ;;  %v1408_v57 = vcombine.high %v548_v53, %v556_v54 }
 0x3ce   :  { %1101 = vmatpush1.bf16.msra.mxu1 %v1445_v58  ;;  %v1453_v58 = vcombine.low %v595_v49, %v603_v50 }
 0x3cf   :  { %1458 = vmatmul.mubr.msk.bf16.vlgmr.msra.gmra.mrb[8].mxu0 %vm89_vm1, %v2105_v37  ;;  %1176 = vmatprep.subr.bf16.mxu1 %v1402_v61  ;;  %v1407_v61 = vcombine.low %v548_v53, %v556_v54 }
 0x3d0   :  { %1136 = vmatpush1.bf16.msra.mxu0 %v1399_v62  ;;  %1167 = vmatprep.mubr.bf16.mxu0 %v1976_v24  ;;  %v1424_v62 = vcombine.high %v564_v59, %v572_v60 }
 0x3d1   :  { %1459 = vmatmul.mubr.msk.bf16.vlgmr.msra.gmra.mrb[8].mxu1 %vm89_vm1, %v2105_v37  ;;  %1137 = vmatprep.subr.bf16.mxu0 %v1416_v3  ;;  %v1423_v3 = vcombine.low %v564_v59, %v572_v60 }
 0x3d2   :  { %1177 = vmatpush1.bf16.msra.mxu1 %v1401_v4  ;;  %1208 = vmatprep.mubr.bf16.mxu1 %v1976_v24  ;;  %v1440_v4 = vcombine.high %v580_v63, %v588_v2 }
 0x3d3   :  { %1178 = vmatprep.subr.bf16.mxu1 %v1418_v7  ;;  %v1439_v7 = vcombine.low %v580_v63, %v588_v2 }
 0x3d4   :  { %1138 = vmatpush1.bf16.msra.mxu0 %v1415_v8  ;;  %v1456_v8 = vcombine.high %v596_v5, %v604_v6 }
 0x3d5   :  { %1139 = vmatprep.subr.bf16.mxu0 %v1432_v10 }
 0x3d6   :  { %1179 = vmatpush1.bf16.msra.mxu1 %v1417_v11  ;;  %v605_v11 = vld [vmem:[#allocation7 + $0x5] sm:$0xff] }
 0x3d7   :  { %1180 = vmatprep.subr.bf16.mxu1 %v1434_v14 }
 0x3d8   :  { %1140 = vmatpush1.bf16.msra.mxu0 %v1431_v15 }
 0x3d9   :  { %1141 = vmatprep.subr.bf16.mxu0 %v1448_v18 }
 0x3da   :  { %1181 = vmatpush1.bf16.msra.mxu1 %v1433_v19 }
 0x3db   :  { %1182 = vmatprep.subr.bf16.mxu1 %v1450_v22 }
 0x3dc   :  { %1142 = vmatpush1.bf16.msra.mxu0 %v1447_v23 }
 0x3dd   :  { %1217 = vmatprep.subr.bf16.mxu0 %v1404_v27 }
 0x3de   :  { %1183 = vmatpush1.bf16.msra.mxu1 %v1449_v28 }
 0x3df   :  { %1460 = vmatmul.mubr.msk.bf16.vlgmr.msra.gmra.mrb[12].mxu0 %vm89_vm1, %v2105_v37  ;;  %1258 = vmatprep.subr.bf16.mxu1 %v1406_v31 }
 0x3e0   :  { %1218 = vmatpush1.bf16.msra.mxu0 %v1403_v32  ;;  %1249 = vmatprep.mubr.bf16.mxu0 %v1976_v24 }
 0x3e1   :  { %1461 = vmatmul.mubr.msk.bf16.vlgmr.msra.gmra.mrb[12].mxu1 %vm89_vm1, %v2105_v37  ;;  %1219 = vmatprep.subr.bf16.mxu0 %v1420_v35 }
 0x3e2   :  { %1259 = vmatpush1.bf16.msra.mxu1 %v1405_v36  ;;  %1290 = vmatprep.mubr.bf16.mxu1 %v1976_v24 }
 0x3e3   :  { %1260 = vmatprep.subr.bf16.mxu1 %v1422_v40 }
 0x3e4   :  { %1220 = vmatpush1.bf16.msra.mxu0 %v1419_v41 }
 0x3e5   :  { %1221 = vmatprep.subr.bf16.mxu0 %v1436_v44 }
 0x3e6   :  { %1261 = vmatpush1.bf16.msra.mxu1 %v1421_v45 }
 0x3e7   :  { %1262 = vmatprep.subr.bf16.mxu1 %v1438_v47 }
 0x3e8   :  { %1222 = vmatpush1.bf16.msra.mxu0 %v1435_v48 }
 0x3e9   :  { %1223 = vmatprep.subr.bf16.mxu0 %v1452_v51 }
 0x3ea   :  { %1263 = vmatpush1.bf16.msra.mxu1 %v1437_v52 }
 0x3eb   :  { %1264 = vmatprep.subr.bf16.mxu1 %v1454_v55 }
 0x3ec   :  { %1224 = vmatpush1.bf16.msra.mxu0 %v1451_v56 }
 0x3ed   :  { %1299 = vmatprep.subr.bf16.mxu0 %v1408_v57 }
 0x3ee   :  { %1265 = vmatpush1.bf16.msra.mxu1 %v1453_v58 }
 0x3ef   :  { %1462 = vmatmul.mubr.msk.bf16.vlgmr.msra.gmra.mrb[16].mxu0 %vm89_vm1, %v2105_v37 }
 0x3f0   :  { %1300 = vmatpush1.bf16.msra.mxu0 %v1407_v61  ;;  %1331 = vmatprep.mubr.bf16.mxu0 %v1976_v24  ;;  %v2130_v24 = vshrl.u32 %v609_v0, 7 }
 0x3f1   :  { %1463 = vmatmul.mubr.msk.bf16.vlgmr.msra.gmra.mrb[16].mxu1 %vm89_vm1, %v2105_v37  ;;  %1301 = vmatprep.subr.bf16.mxu0 %v1424_v62 }
 0x3f2   :  { %v611_v10 = vsub.s32 0, %v2130_v24  ;;  %v615_v12 = vsub.s32 1, %v2130_v24 }
 0x3f4   :  { %1302 = vmatpush1.bf16.msra.mxu0 %v1423_v3  ;;  %v612_v14 = vrot.slane %v605_v11, %v611_v10  ;;  %v616_v16 = vrot.slane %v605_v11, %v615_v12 }
 0x3f5   :  { %1303 = vmatprep.subr.bf16.mxu0 %v1440_v4 }
 0x3f8   :  { %1304 = vmatpush1.bf16.msra.mxu0 %v1439_v7 }
 0x3f9   :  { %1305 = vmatprep.subr.bf16.mxu0 %v1456_v8 }
 0x3fc   :  { %1306 = vmatpush1.bf16.msra.mxu0 %v1455_v9 }
 0x3ff   :  { %1464 = vmatmul.mubr.msk.bf16.vlgmr.msra.gmra.mrb[20].mxu0 %vm89_vm1, %v2105_v37 }
 0x492   :  { %v535_v15 = vpop.f32.mrb[4].mxu0 }
 0x493   :  { %v536_v17 = vadd.f32 %v1392_v13, %v535_v15  ;;  %v1700_v37 = vpop.f32.mrb[5].mxu0 }
 0x494   :  { %v1046_v18 = vpop.f32.mrb[4].mxu1 }
 0x495   :  { %539 = vst [vmem:[#allocation11] sm:$0xff] %v536_v17  ;;  %v1047_v19 = vadd.f32 %v1046_v18, %v612_v14  ;;  %v1048_v20 = vpop.f32.mrb[5].mxu1 }
 0x496   :  { %v1049_v21 = vadd.f32 %v1048_v20, %v616_v16  ;;  %v1050_v22 = vpop.f32.mrb[6].mxu1 }
 0x497   :  { %1922 = shalt.err (!%p1919_p8)
}
 0x498   :  { %s1923_s21 = scalar_lea.hbm %s2177_s5, 128 }
 0x499   :  { %p1924_p9 = scmp.ne.s32.totalorder %s2177_s5, %s1923_s21  ;;  %p1927_p10 = scmp.lt.u32.totalorder %s1923_s21, %s2177_s5 }
 0x49b   :  { %p1929_p11 = pnand %p1927_p10, %p1924_p9 }
 0x49d   :  { %1932 = shalt.err (!%p1929_p11)
}
 0x49e   :  { %1375 = dma.vmem_to_hbm [thread:$0]  %s1373_s1, 128, %s2177_s5, [#allocation12]   ;;  %1340 = vst [vmem:[#allocation10] sm:$0xff] %v1047_v19  ;;  %v1051_v23 = vpop.f32.mrb[7].mxu1  ;;  %1341 = vst [vmem:[#allocation10 + $0x8] sm:$0xff] %v1049_v21  ;;  %v619_v25 = vsub.s32 2, %v2130_v24 }
 0x49f   :  { %v623_v26 = vsub.s32 3, %v2130_v24  ;;  %v627_v27 = vsub.s32 4, %v2130_v24  ;;  %v631_v28 = vsub.s32 5, %v2130_v24  ;;  %v635_v46 = vsub.s32 6, %v2130_v24  ;;  %v606_v47 = vld [vmem:[#allocation7 + $0xd] sm:$0xff]  ;;  %s1978_s5 = smov [#allocation10]  }
 0x4a0   :  { %v620_v29 = vrot.slane %v605_v11, %v619_v25  ;;  %v639_v1 = vsub.s32 7, %v2130_v24  ;;  %v644_v50 = vrot.slane %v606_v47, %v611_v10  ;;  %v648_v52 = vrot.slane %v606_v47, %v615_v12  ;;  %s1362_s28 = sshll.u32 %s1978_s5, 4  ;;  %s1363_s28 = int_to_ptr.vmem [resolvable:$true] %s1362_s28 }
 0x4a1   :  { %v624_v30 = vrot.slane %v605_v11, %v623_v26  ;;  %v628_v31 = vrot.slane %v605_v11, %v627_v27  ;;  %v632_v33 = vrot.slane %v605_v11, %v631_v28  ;;  %v636_v48 = vrot.slane %v605_v11, %v635_v46  ;;  %s1933_s0 = scalar_lea.vmem %s1363_s28, 2048  ;;  %p1938_p13 = scmp.lt.s32.totalorder %s1363_s28, %s1363_s28 }
 0x4a2   :  { %v1087_v32 = vpop.f32.mrb[8].mxu0  ;;  %v640_v49 = vrot.slane %v605_v11, %v639_v1  ;;  %v652_v2 = vrot.slane %v606_v47, %v619_v25  ;;  %v656_v3 = vrot.slane %v606_v47, %v623_v26  ;;  %v660_v4 = vrot.slane %v606_v47, %v627_v27  ;;  %p1934_p12 = scmp.ne.s32.totalorder %s1363_s28, %s1933_s0  ;;  %p1939_p0 = scmp.lt.s32.totalorder %s1933_s0, %s1933_s0 }
 0x4a3   :  { %v1088_v34 = vadd.f32 %v1087_v32, %v620_v29  ;;  %v1089_v35 = vpop.f32.mrb[9].mxu0  ;;  %v664_v6 = vrot.slane %v606_v47, %v631_v28  ;;  %v668_v16 = vrot.slane %v606_v47, %v635_v46  ;;  %v672_v17 = vrot.slane %v606_v47, %v639_v1 }
 0x4a4   :  { %v1090_v36 = vadd.f32 %v1089_v35, %v624_v30  ;;  %v1091_v38 = vpop.f32.mrb[10].mxu0  ;;  %v1128_v39 = vpop.f32.mrb[8].mxu1  ;;  %p1940_p1 = por %p1939_p0, %p1938_p13 }
 0x4a5   :  { %1342 = vst [vmem:[#allocation10 + $0x10] sm:$0xff] %v1088_v34  ;;  %v1129_v40 = vadd.f32 %v1128_v39, %v628_v31  ;;  %v1092_v41 = vpop.f32.mrb[11].mxu0  ;;  %v1130_v42 = vpop.f32.mrb[9].mxu1 }
 0x4a6   :  { %1343 = vst [vmem:[#allocation10 + $0x18] sm:$0xff] %v1090_v36  ;;  %v1131_v43 = vadd.f32 %v1130_v42, %v632_v33  ;;  %v1132_v44 = vpop.f32.mrb[10].mxu1  ;;  %p1941_p2 = pnand %p1940_p1, %p1934_p12 }
 0x4a7   :  { %1344 = vst [vmem:[#allocation10 + $0x20] sm:$0xff] %v1129_v40  ;;  %v1133_v45 = vpop.f32.mrb[11].mxu1 }
 0x4a8   :  { %1345 = vst [vmem:[#allocation10 + $0x28] sm:$0xff] %v1131_v43 }
 0x4b2   :  { %v1169_v51 = vpop.f32.mrb[12].mxu0 }
 0x4b3   :  { %v1170_v53 = vadd.f32 %v1169_v51, %v636_v48  ;;  %v1171_v54 = vpop.f32.mrb[13].mxu0 }
 0x4b4   :  { %v1172_v55 = vadd.f32 %v1171_v54, %v640_v49  ;;  %v1173_v56 = vpop.f32.mrb[14].mxu0  ;;  %v1210_v57 = vpop.f32.mrb[12].mxu1 }
 0x4b5   :  { %1346 = vst [vmem:[#allocation10 + $0x30] sm:$0xff] %v1170_v53  ;;  %v1211_v58 = vadd.f32 %v1210_v57, %v644_v50  ;;  %v1174_v59 = vpop.f32.mrb[15].mxu0  ;;  %v1212_v60 = vpop.f32.mrb[13].mxu1 }
 0x4b6   :  { %1347 = vst [vmem:[#allocation10 + $0x38] sm:$0xff] %v1172_v55  ;;  %v1213_v61 = vadd.f32 %v1212_v60, %v648_v52  ;;  %v1214_v62 = vpop.f32.mrb[14].mxu1 }
 0x4b7   :  { %1348 = vst [vmem:[#allocation10 + $0x40] sm:$0xff] %v1211_v58  ;;  %v1215_v63 = vpop.f32.mrb[15].mxu1 }
 0x4b8   :  { %1349 = vst [vmem:[#allocation10 + $0x48] sm:$0xff] %v1213_v61 }
 0x4c2   :  { %v1251_v5 = vpop.f32.mrb[16].mxu0 }
 0x4c3   :  { %v1252_v7 = vadd.f32 %v1251_v5, %v652_v2  ;;  %v1253_v8 = vpop.f32.mrb[17].mxu0 }
 0x4c4   :  { %v1254_v9 = vadd.f32 %v1253_v8, %v656_v3  ;;  %v1255_v0 = vpop.f32.mrb[18].mxu0  ;;  %v1292_v24 = vpop.f32.mrb[16].mxu1 }
 0x4c5   :  { %1350 = vst [vmem:[#allocation10 + $0x50] sm:$0xff] %v1252_v7  ;;  %v1293_v10 = vadd.f32 %v1292_v24, %v660_v4  ;;  %v1256_v11 = vpop.f32.mrb[19].mxu0  ;;  %v1294_v12 = vpop.f32.mrb[17].mxu1 }
 0x4c6   :  { %1351 = vst [vmem:[#allocation10 + $0x58] sm:$0xff] %v1254_v9  ;;  %v1295_v13 = vadd.f32 %v1294_v12, %v664_v6  ;;  %v1296_v14 = vpop.f32.mrb[18].mxu1 }
 0x4c7   :  { %1352 = vst [vmem:[#allocation10 + $0x60] sm:$0xff] %v1293_v10  ;;  %v1297_v15 = vpop.f32.mrb[19].mxu1 }
 0x4c8   :  { %1353 = vst [vmem:[#allocation10 + $0x68] sm:$0xff] %v1295_v13 }
 0x4d2   :  { %v1333_v37 = vpop.f32.mrb[20].mxu0 }
 0x4d3   :  { %v1334_v18 = vadd.f32 %v1333_v37, %v668_v16  ;;  %v1335_v19 = vpop.f32.mrb[21].mxu0 }
 0x4d4   :  { %v1336_v20 = vadd.f32 %v1335_v19, %v672_v17  ;;  %v1337_v21 = vpop.f32.mrb[22].mxu0 }
 0x4d5   :  { %1354 = vst [vmem:[#allocation10 + $0x70] sm:$0xff] %v1334_v18  ;;  %v1338_v22 = vpop.f32.mrb[23].mxu0 }
 0x4d6   :  { %1355 = vst [vmem:[#allocation10 + $0x78] sm:$0xff] %v1336_v20 }
 0x4d7   :  { %1944 = shalt.err (!%p1941_p2)
}
 0x4d8   :  { %s1945_s6 = scalar_lea.hbm %s2176_s4, 2048 }
 0x4d9   :  { %p1946_p3 = scmp.ne.s32.totalorder %s2176_s4, %s1945_s6  ;;  %p1949_p4 = scmp.lt.u32.totalorder %s1945_s6, %s2176_s4 }
 0x4db   :  { %p1951_p5 = pnand %p1949_p4, %p1946_p3 }
 0x4dd   :  { %1954 = shalt.err (!%p1951_p5)
}
 0x4de   :  { %1365 = dma.vmem_to_hbm [thread:$0]  %s1363_s28, 2048, %s2176_s4, [#allocation4]  }
 0x4df   :  { %1961 = dma.done.wait [#allocation4], 2048  }
 0x4e0   :  { %1962 = vsyncadd [#allocation4], 4294965248 }
 0x4e1   :  { %1963 = dma.done.wait [#allocation12], 128  }
 0x4e2   :  { %1964 = vsyncadd [#allocation12], 4294967168 }
 0x4e3   :  { %1382 = vsyncpa [#allocation3], 1 }
 0x4e4   :  { %1383 = vsyncpa [#allocation6], 1 }
 0x4e5   :  { %1384 = vsyncpa [#allocation9], 1 }
 0x4e6   :  { %1385 = vsyncpa [#allocation4], 1 }
 0x4e7   :  { %1386 = vsyncpa [#allocation12], 1 }

</bundles_post_ra>
